<compile_context>
chip_gen: v7x
topology: tpu7x:2x2x1
jax: 0.10.0
libtpu: 0.0.40
codegen_flags: <defaults>
</compile_context>

<pallas_src>
import functools

import jax
import jax.numpy as jnp
from jax import lax
from jax.experimental import pallas as pl
from jax.experimental.pallas import tpu as pltpu


_NUM_SPATIAL_SLICES = 2          # leading "parallel" grid axis (both TCs on v7x)
_TARGET_BLOCK_BYTES = 4 << 20    # ~4 MiB input blocks -> grid-step overhead negligible


def _choose_spatial_tile(n, c, s, itemsize):
    """Lane-axis spatial tile: multiple of 128 (or the full S when S < 128)."""
    if s < 128:
        return s                                      # "equals full dim" satisfies (8,128) rule
    ts = _TARGET_BLOCK_BYTES // max(1, n * c * itemsize)
    ts = (ts // 128) * 128
    ts = max(128, min(ts, (s // 128) * 128))          # multiple of 128, ts <= S
    return ts


# ----------------------------------------------------------------------------
# Kernel 1: streaming spatial sum/max reduction over (N, C, S), S on lanes.
# Grid = (P, K): P spatial slices ("parallel"; both TCs on v7x), K blocks per
# slice ("arbitrary").  Each slice writes a partial (1, N, C) sum and max slab.
# ----------------------------------------------------------------------------
def _pool_reduce_kernel(x_ref, sum_ref, max_ref, sum_acc, max_acc,
                        *, s_total, ts, blocks_per_slice, may_mask):
    p = pl.program_id(0)
    k = pl.program_id(1)

    @pl.when(k == 0)
    def _():
        sum_acc[...] = jnp.zeros_like(sum_acc)
        max_acc[...] = jnp.full_like(max_acc, -jnp.inf)

    xb = x_ref[...].astype(jnp.float32)               # (N, C, ts), f32 accumulation
    start = (p * blocks_per_slice + k) * ts           # nominal spatial offset of block

    if may_mask:
        @pl.when(start + ts <= s_total)               # full in-bounds block: no mask work
        def _():
            sum_acc[...] += xb.sum(axis=-1)
            max_acc[...] = jnp.maximum(max_acc[...], xb.max(axis=-1))

        @pl.when(start + ts > s_total)                # ragged / fully-OOB block: mask tail
        def _():
            lane = lax.broadcasted_iota(jnp.int32, (1, 1, ts), 2) + start
            valid = lane < s_total
            sum_acc[...] += jnp.where(valid, xb, 0.0).sum(axis=-1)
            max_acc[...] = jnp.maximum(
                max_acc[...], jnp.where(valid, xb, -jnp.inf).max(axis=-1))
    else:
        sum_acc[...] += xb.sum(axis=-1)
        max_acc[...] = jnp.maximum(max_acc[...], xb.max(axis=-1))

    @pl.when(k == pl.num_programs(1) - 1)
    def _():
        sum_ref[0] = sum_acc[...]
        max_ref[0] = max_acc[...]


# ----------------------------------------------------------------------------
# Kernel 2 (tiny, single invocation): combine per-slice partials, shared MLP
# on the stacked [avg; max] matrix, add halves, sigmoid.
# ----------------------------------------------------------------------------
def _mlp_sigmoid_kernel(sum_ref, max_ref, w1_ref, w2_ref, o_ref, *, n, s_total):
    psum = sum_ref[0]
    pmax = max_ref[0]
    for i in range(1, sum_ref.shape[0]):              # combine the P partial slices
        psum = psum + sum_ref[i]
        pmax = jnp.maximum(pmax, max_ref[i])

    avg = psum * (1.0 / float(s_total))               # (N, C)
    v = jnp.concatenate([avg, pmax], axis=0)          # (2N, C): one MLP pass for both pools
    h = jnp.maximum(jnp.dot(v, w1_ref[...], preferred_element_type=jnp.float32), 0.0)
    z2 = jnp.dot(h, w2_ref[...], preferred_element_type=jnp.float32)   # (2N, C)
    z = z2[:n] + z2[n:]                               # mlp(avg) + mlp(max)
    o_ref[...] = pl.reciprocal(1.0 + jnp.exp(-z)).astype(o_ref.dtype)  # sigmoid


def channel_attention(x_ncdhw, w1, w2):
    """x: (N, C, D, H, W) like PyTorch.  w1: (C//r, C, 1,1,1).  w2: (C, C//r, 1,1,1).

    Returns (N, C, 1, 1, 1) attention, matching ChannelAttention.forward.
    """
    n, c, d, h, w = x_ncdhw.shape
    cr = w1.shape[0]
    assert w1.shape[1] == c and w2.shape[0] == c and w2.shape[1] == cr

    s = d * h * w
    x = x_ncdhw.reshape(n, c, s)                      # free contiguous reshape; NO transpose

    ts = _choose_spatial_tile(n, c, s, x.dtype.itemsize)
    nb = pl.cdiv(s, ts)                               # spatial blocks (no jnp.pad)
    P = _NUM_SPATIAL_SLICES
    K = pl.cdiv(nb, P)                                # blocks per parallel slice
    may_mask = (s % ts != 0) or (P * K != nb)
    last_block = nb - 1

    sums, maxes = pl.pallas_call(
        functools.partial(_pool_reduce_kernel, s_total=s, ts=ts,
                          blocks_per_slice=K, may_mask=may_mask),
        out_shape=(jax.ShapeDtypeStruct((P, n, c), jnp.float32),
                   jax.ShapeDtypeStruct((P, n, c), jnp.float32)),
        grid_spec=pltpu.PrefetchScalarGridSpec(
            num_scalar_prefetch=0,
            grid=(P, K),
            in_specs=[
                # Clamp the block index so a slice that runs past the end never
                # DMAs a fully out-of-bounds block; the in-kernel mask (based on
                # the nominal offset) zeroes its contribution anyway.
                pl.BlockSpec(
                    (n, c, ts),
                    lambda p, k: (0, 0, jnp.minimum(p * K + k, last_block))),
            ],
            out_specs=[
                pl.BlockSpec((1, n, c), lambda p, k: (p, 0, 0)),
                pl.BlockSpec((1, n, c), lambda p, k: (p, 0, 0)),
            ],
            scratch_shapes=[pltpu.VMEM((n, c), jnp.float32),   # running sum (per core)
                            pltpu.VMEM((n, c), jnp.float32)],  # running max (per core)
        ),
        compiler_params=pltpu.CompilerParams(
            dimension_semantics=("parallel", "arbitrary"),
            vmem_limit_bytes=32 << 20),
    )(x)

    # 1x1x1 convs as matmuls: fc1 (C//r, C) -> (C, C//r); fc2 (C, C//r) -> (C//r, C).
    w1m = jnp.transpose(w1.reshape(cr, c)).astype(jnp.float32)
    w2m = jnp.transpose(w2.reshape(c, cr)).astype(jnp.float32)

    att = pl.pallas_call(
        functools.partial(_mlp_sigmoid_kernel, n=n, s_total=s),
        out_shape=jax.ShapeDtypeStruct((n, c), x_ncdhw.dtype),
    )(sums, maxes, w1m, w2m)

    return att.reshape(n, c, 1, 1, 1)


# ----------------------------------------------------------------------------
# Pure-JAX reference (mirrors the PyTorch module) for a correctness check
# ----------------------------------------------------------------------------
def channel_attention_ref(x, w1, w2):
    n, c = x.shape[0], x.shape[1]
    cr = w1.shape[0]
    avg = jnp.mean(x, axis=(2, 3, 4))                 # AdaptiveAvgPool3d(1)
    mx = jnp.max(x, axis=(2, 3, 4))                   # AdaptiveMaxPool3d(1)
    w1m = w1.reshape(cr, c)
    w2m = w2.reshape(c, cr)

    def mlp(v):
        h = jnp.maximum(v @ w1m.T, 0.0)
        return h @ w2m.T

    return jax.nn.sigmoid(mlp(avg) + mlp(mx)).reshape(n, c, 1, 1, 1)


if __name__ == "__main__":
    key = jax.random.PRNGKey(0)
    kx, k1, k2 = jax.random.split(key, 3)

    n, c, ratio = 2, 32, 4
    w1 = jax.random.normal(k1, (c // ratio, c, 1, 1, 1), jnp.float32) / jnp.sqrt(float(c))
    w2 = jax.random.normal(k2, (c, c // ratio, 1, 1, 1), jnp.float32) / jnp.sqrt(float(c // ratio))

    fn = jax.jit(channel_attention)

    # Case 1: tile-aligned spatial size.
    x = jax.random.normal(kx, (n, c, 8, 8, 8), jnp.float32)
    y = jax.block_until_ready(fn(x, w1, w2))
    y_ref = channel_attention_ref(x, w1, w2)
    assert y.shape == (n, c, 1, 1, 1)
    assert bool(jnp.all(jnp.isfinite(y)))
    assert bool(jnp.allclose(y, y_ref, atol=1e-5, rtol=1e-5))

    # Case 2: ragged spatial size (exercises the masked tail / OOB-slice path).
    x2 = jax.random.normal(kx, (n, c, 5, 6, 7), jnp.float32)
    y2 = jax.block_until_ready(fn(x2, w1, w2))
    y2_ref = channel_attention_ref(x2, w1, w2)
    assert bool(jnp.all(jnp.isfinite(y2)))
    assert bool(jnp.allclose(y2, y2_ref, atol=1e-5, rtol=1e-5))

    print("KERNEL_OK")
</pallas_src>

<mosaic_0001>
module attributes {stable_mosaic.version = 11 : i64} {
  func.func @_mlp_sigmoid_kernel(%arg0: memref<2x2x32xf32, #tpu.memory_space<vmem>>, %arg1: memref<2x2x32xf32, #tpu.memory_space<vmem>>, %arg2: memref<32x8xf32, #tpu.memory_space<vmem>>, %arg3: memref<8x32xf32, #tpu.memory_space<vmem>>, %arg4: memref<2x32xf32, #tpu.memory_space<vmem>>) attributes {dimension_semantics = [], scalar_prefetch = 0 : i64, scratch_operands = 0 : i64, tpu.core_type = #tpu.core_type<tc>} {
    %c0 = arith.constant 0 : index
    %c0_0 = arith.constant 0 : index
    %c0_1 = arith.constant 0 : index
    %0 = vector.load %arg0[%c0, %c0_0, %c0_1] : memref<2x2x32xf32, #tpu.memory_space<vmem>>, vector<1x2x32xf32>
    %1 = vector.shape_cast %0 : vector<1x2x32xf32> to vector<2x32xf32>
    %c0_2 = arith.constant 0 : index
    %c0_3 = arith.constant 0 : index
    %c0_4 = arith.constant 0 : index
    %2 = vector.load %arg1[%c0_2, %c0_3, %c0_4] : memref<2x2x32xf32, #tpu.memory_space<vmem>>, vector<1x2x32xf32>
    %3 = vector.shape_cast %2 : vector<1x2x32xf32> to vector<2x32xf32>
    %c1 = arith.constant 1 : index
    %c0_5 = arith.constant 0 : index
    %c0_6 = arith.constant 0 : index
    %4 = vector.load %arg0[%c1, %c0_5, %c0_6] : memref<2x2x32xf32, #tpu.memory_space<vmem>>, vector<1x2x32xf32>
    %5 = vector.shape_cast %4 : vector<1x2x32xf32> to vector<2x32xf32>
    %6 = arith.addf %1, %5 : vector<2x32xf32>
    %c1_7 = arith.constant 1 : index
    %c0_8 = arith.constant 0 : index
    %c0_9 = arith.constant 0 : index
    %7 = vector.load %arg1[%c1_7, %c0_8, %c0_9] : memref<2x2x32xf32, #tpu.memory_space<vmem>>, vector<1x2x32xf32>
    %8 = vector.shape_cast %7 : vector<1x2x32xf32> to vector<2x32xf32>
    %9 = arith.maximumf %3, %8 : vector<2x32xf32>
    %cst = arith.constant 0.001953125 : f32
    %10 = vector.broadcast %cst : f32 to vector<2x32xf32>
    %11 = arith.mulf %6, %10 : vector<2x32xf32>
    %12 = tpu.concatenate %11, %9 in 0 : vector<2x32xf32>, vector<2x32xf32> -> vector<4x32xf32>
    %c0_10 = arith.constant 0 : index
    %c0_11 = arith.constant 0 : index
    %13 = vector.load %arg2[%c0_10, %c0_11] : memref<32x8xf32, #tpu.memory_space<vmem>>, vector<32x8xf32>
    %cst_12 = arith.constant dense<0.000000e+00> : vector<4x8xf32>
    %14 = tpu.matmul %12, %13, %cst_12 {dimension_numbers = #tpu.dot_dimension_numbers<[1], [0], [0], [1], [0, 0, 1, 1], [], []>} : vector<4x32xf32>, vector<32x8xf32>, vector<4x8xf32> -> vector<4x8xf32>
    %cst_13 = arith.constant 0.000000e+00 : f32
    %15 = vector.broadcast %cst_13 : f32 to vector<4x8xf32>
    %16 = arith.maximumf %14, %15 : vector<4x8xf32>
    %c0_14 = arith.constant 0 : index
    %c0_15 = arith.constant 0 : index
    %17 = vector.load %arg3[%c0_14, %c0_15] : memref<8x32xf32, #tpu.memory_space<vmem>>, vector<8x32xf32>
    %cst_16 = arith.constant dense<0.000000e+00> : vector<4x32xf32>
    %18 = tpu.matmul %16, %17, %cst_16 {dimension_numbers = #tpu.dot_dimension_numbers<[1], [0], [0], [1], [0, 0, 1, 1], [], []>} : vector<4x8xf32>, vector<8x32xf32>, vector<4x32xf32> -> vector<4x32xf32>
    %19 = vector.extract_strided_slice %18 {offsets = [0, 0], sizes = [2, 32], strides = [1, 1]} : vector<4x32xf32> to vector<2x32xf32>
    %20 = vector.extract_strided_slice %18 {offsets = [2, 0], sizes = [2, 32], strides = [1, 1]} : vector<4x32xf32> to vector<2x32xf32>
    %21 = arith.addf %19, %20 : vector<2x32xf32>
    %cst_17 = arith.constant 0.000000e+00 : f32
    %22 = vector.broadcast %cst_17 : f32 to vector<2x32xf32>
    %23 = arith.subf %22, %21 : vector<2x32xf32>
    %24 = math.exp %23 : vector<2x32xf32>
    %cst_18 = arith.constant 1.000000e+00 : f32
    %25 = vector.broadcast %cst_18 : f32 to vector<2x32xf32>
    %26 = arith.addf %25, %24 : vector<2x32xf32>
    %27 = tpu.reciprocal %26 : vector<2x32xf32> -> vector<2x32xf32>
    %c0_19 = arith.constant 0 : index
    %c0_20 = arith.constant 0 : index
    %28 = vector.load %arg4[%c0_19, %c0_20] : memref<2x32xf32, #tpu.memory_space<vmem>>, vector<2x32xf32>
    tpu.vector_store %arg4[%c0_19, %c0_20], %27 {strides = array<i32>} : memref<2x32xf32, #tpu.memory_space<vmem>>, vector<2x32xf32>,
    return
  }
}

module attributes {stable_mosaic.version = 11 : i64} {
  func.func @_pool_reduce_kernel(%arg0: i32, %arg1: i32, %arg2: memref<2x32x512xf32, #tpu.memory_space<vmem>>, %arg3: memref<1x2x32xf32, #tpu.memory_space<vmem>>, %arg4: memref<1x2x32xf32, #tpu.memory_space<vmem>>, %arg5: memref<2x32xf32, #tpu.memory_space<vmem>>, %arg6: memref<2x32xf32, #tpu.memory_space<vmem>>) attributes {dimension_semantics = [#tpu.dimension_semantics<parallel>, #tpu.dimension_semantics<arbitrary>], iteration_bounds = array<i64: 2, 1>, scalar_prefetch = 0 : i64, scratch_operands = 2 : i64, tpu.core_type = #tpu.core_type<tc>, window_params = [{transform_indices = @transform_0, window_bounds = array<i64: 2, 32, 512>}, {transform_indices = @transform_1, window_bounds = array<i64: 1, 2, 32>}, {transform_indices = @transform_2, window_bounds = array<i64: 1, 2, 32>}]} {
    %c0_i32 = arith.constant 0 : i32
    %0 = arith.cmpi eq, %arg1, %c0_i32 : i32
    %1 = arith.extui %0 : i1 to i32
    %c0_i32_0 = arith.constant 0 : i32
    %2 = arith.cmpi ne, %1, %c0_i32_0 : i32
    scf.if %2 {
      %cst = arith.constant 0.000000e+00 : f32
      %18 = vector.broadcast %cst : f32 to vector<2x32xf32>
      %c0_11 = arith.constant 0 : index
      %c0_12 = arith.constant 0 : index
      %19 = vector.load %arg5[%c0_11, %c0_12] : memref<2x32xf32, #tpu.memory_space<vmem>>, vector<2x32xf32>
      tpu.vector_store %arg5[%c0_11, %c0_12], %18 {strides = array<i32>} : memref<2x32xf32, #tpu.memory_space<vmem>>, vector<2x32xf32>,
      %cst_13 = arith.constant 0xFF800000 : f32
      %20 = vector.broadcast %cst_13 : f32 to vector<2x32xf32>
      %c0_14 = arith.constant 0 : index
      %c0_15 = arith.constant 0 : index
      %21 = vector.load %arg6[%c0_14, %c0_15] : memref<2x32xf32, #tpu.memory_space<vmem>>, vector<2x32xf32>
      tpu.vector_store %arg6[%c0_14, %c0_15], %20 {strides = array<i32>} : memref<2x32xf32, #tpu.memory_space<vmem>>, vector<2x32xf32>,
    } else {
    }
    %c0 = arith.constant 0 : index
    %c0_1 = arith.constant 0 : index
    %c0_2 = arith.constant 0 : index
    %3 = vector.load %arg2[%c0, %c0_1, %c0_2] : memref<2x32x512xf32, #tpu.memory_space<vmem>>, vector<2x32x512xf32>
    %c1_i32 = arith.constant 1 : i32
    %4 = arith.muli %arg0, %c1_i32 : i32
    %5 = arith.addi %4, %arg1 : i32
    %c512_i32 = arith.constant 512 : i32
    %6 = arith.muli %5, %c512_i32 : i32
    %c512_i32_3 = arith.constant 512 : i32
    %7 = arith.addi %6, %c512_i32_3 : i32
    %c512_i32_4 = arith.constant 512 : i32
    %8 = arith.cmpi sle, %7, %c512_i32_4 : i32
    %9 = arith.extui %8 : i1 to i32
    %c0_i32_5 = arith.constant 0 : i32
    %10 = arith.cmpi ne, %9, %c0_i32_5 : i32
    scf.if %10 {
      %c0_11 = arith.constant 0 : index
      %c0_12 = arith.constant 0 : index
      %18 = vector.load %arg5[%c0_11, %c0_12] : memref<2x32xf32, #tpu.memory_space<vmem>>, vector<2x32xf32>
      %cst = arith.constant dense<0.000000e+00> : vector<2x32xf32>
      %19 = vector.multi_reduction <add>, %3, %cst [2] : vector<2x32x512xf32> to vector<2x32xf32>
      %20 = arith.addf %18, %19 : vector<2x32xf32>
      %c0_13 = arith.constant 0 : index
      %c0_14 = arith.constant 0 : index
      %21 = vector.load %arg5[%c0_13, %c0_14] : memref<2x32xf32, #tpu.memory_space<vmem>>, vector<2x32xf32>
      tpu.vector_store %arg5[%c0_13, %c0_14], %20 {strides = array<i32>} : memref<2x32xf32, #tpu.memory_space<vmem>>, vector<2x32xf32>,
      %c0_15 = arith.constant 0 : index
      %c0_16 = arith.constant 0 : index
      %22 = vector.load %arg6[%c0_15, %c0_16] : memref<2x32xf32, #tpu.memory_space<vmem>>, vector<2x32xf32>
      %cst_17 = arith.constant dense<0xFF800000> : vector<2x32xf32>
      %23 = vector.multi_reduction <maximumf>, %3, %cst_17 [2] : vector<2x32x512xf32> to vector<2x32xf32>
      %24 = arith.maximumf %22, %23 : vector<2x32xf32>
      %c0_18 = arith.constant 0 : index
      %c0_19 = arith.constant 0 : index
      %25 = vector.load %arg6[%c0_18, %c0_19] : memref<2x32xf32, #tpu.memory_space<vmem>>, vector<2x32xf32>
      tpu.vector_store %arg6[%c0_18, %c0_19], %24 {strides = array<i32>} : memref<2x32xf32, #tpu.memory_space<vmem>>, vector<2x32xf32>,
    } else {
    }
    %c512_i32_6 = arith.constant 512 : i32
    %11 = arith.addi %6, %c512_i32_6 : i32
    %c512_i32_7 = arith.constant 512 : i32
    %12 = arith.cmpi sgt, %11, %c512_i32_7 : i32
    %13 = arith.extui %12 : i1 to i32
    %c0_i32_8 = arith.constant 0 : i32
    %14 = arith.cmpi ne, %13, %c0_i32_8 : i32
    scf.if %14 {
      %18 = tpu.iota {dimensions = array<i32: 2>} : vector<1x1x512xi32>
      %19 = vector.broadcast %6 : i32 to vector<1x1x512xi32>
      %20 = arith.addi %18, %19 : vector<1x1x512xi32>
      %c512_i32_11 = arith.constant 512 : i32
      %21 = vector.broadcast %c512_i32_11 : i32 to vector<1x1x512xi32>
      %22 = arith.cmpi slt, %20, %21 : vector<1x1x512xi32>
      %c0_12 = arith.constant 0 : index
      %c0_13 = arith.constant 0 : index
      %23 = vector.load %arg5[%c0_12, %c0_13] : memref<2x32xf32, #tpu.memory_space<vmem>>, vector<2x32xf32>
      %cst = arith.constant 0.000000e+00 : f32
      %24 = vector.shape_cast %22 : vector<1x1x512xi1> to vector<1x1x512xi1>
      %25 = vector.broadcast %24 : vector<1x1x512xi1> to vector<2x32x512xi1>
      %26 = vector.broadcast %cst : f32 to vector<2x32x512xf32>
      %27 = arith.select %25, %3, %26 : vector<2x32x512xi1>, vector<2x32x512xf32>
      %cst_14 = arith.constant dense<0.000000e+00> : vector<2x32xf32>
      %28 = vector.multi_reduction <add>, %27, %cst_14 [2] : vector<2x32x512xf32> to vector<2x32xf32>
      %29 = arith.addf %23, %28 : vector<2x32xf32>
      %c0_15 = arith.constant 0 : index
      %c0_16 = arith.constant 0 : index
      %30 = vector.load %arg5[%c0_15, %c0_16] : memref<2x32xf32, #tpu.memory_space<vmem>>, vector<2x32xf32>
      tpu.vector_store %arg5[%c0_15, %c0_16], %29 {strides = array<i32>} : memref<2x32xf32, #tpu.memory_space<vmem>>, vector<2x32xf32>,
      %c0_17 = arith.constant 0 : index
      %c0_18 = arith.constant 0 : index
      %31 = vector.load %arg6[%c0_17, %c0_18] : memref<2x32xf32, #tpu.memory_space<vmem>>, vector<2x32xf32>
      %cst_19 = arith.constant 0xFF800000 : f32
      %32 = vector.shape_cast %22 : vector<1x1x512xi1> to vector<1x1x512xi1>
      %33 = vector.broadcast %32 : vector<1x1x512xi1> to vector<2x32x512xi1>
      %34 = vector.broadcast %cst_19 : f32 to vector<2x32x512xf32>
      %35 = arith.select %33, %3, %34 : vector<2x32x512xi1>, vector<2x32x512xf32>
      %cst_20 = arith.constant dense<0xFF800000> : vector<2x32xf32>
      %36 = vector.multi_reduction <maximumf>, %35, %cst_20 [2] : vector<2x32x512xf32> to vector<2x32xf32>
      %37 = arith.maximumf %31, %36 : vector<2x32xf32>
      %c0_21 = arith.constant 0 : index
      %c0_22 = arith.constant 0 : index
      %38 = vector.load %arg6[%c0_21, %c0_22] : memref<2x32xf32, #tpu.memory_space<vmem>>, vector<2x32xf32>
      tpu.vector_store %arg6[%c0_21, %c0_22], %37 {strides = array<i32>} : memref<2x32xf32, #tpu.memory_space<vmem>>, vector<2x32xf32>,
    } else {
    }
    %c0_i32_9 = arith.constant 0 : i32
    %15 = arith.cmpi eq, %arg1, %c0_i32_9 : i32
    %16 = arith.extui %15 : i1 to i32
    %c0_i32_10 = arith.constant 0 : i32
    %17 = arith.cmpi ne, %16, %c0_i32_10 : i32
    scf.if %17 {
      %c0_11 = arith.constant 0 : index
      %c0_12 = arith.constant 0 : index
      %18 = vector.load %arg5[%c0_11, %c0_12] : memref<2x32xf32, #tpu.memory_space<vmem>>, vector<2x32xf32>
      %c0_13 = arith.constant 0 : index
      %c0_14 = arith.constant 0 : index
      %c0_15 = arith.constant 0 : index
      %19 = vector.load %arg3[%c0_13, %c0_14, %c0_15] : memref<1x2x32xf32, #tpu.memory_space<vmem>>, vector<1x2x32xf32>
      %20 = vector.shape_cast %19 : vector<1x2x32xf32> to vector<2x32xf32>
      %21 = vector.shape_cast %18 : vector<2x32xf32> to vector<1x2x32xf32>
      tpu.vector_store %arg3[%c0_13, %c0_14, %c0_15], %21 {strides = array<i32>} : memref<1x2x32xf32, #tpu.memory_space<vmem>>, vector<1x2x32xf32>,
      %c0_16 = arith.constant 0 : index
      %c0_17 = arith.constant 0 : index
      %22 = vector.load %arg6[%c0_16, %c0_17] : memref<2x32xf32, #tpu.memory_space<vmem>>, vector<2x32xf32>
      %c0_18 = arith.constant 0 : index
      %c0_19 = arith.constant 0 : index
      %c0_20 = arith.constant 0 : index
      %23 = vector.load %arg4[%c0_18, %c0_19, %c0_20] : memref<1x2x32xf32, #tpu.memory_space<vmem>>, vector<1x2x32xf32>
      %24 = vector.shape_cast %23 : vector<1x2x32xf32> to vector<2x32xf32>
      %25 = vector.shape_cast %22 : vector<2x32xf32> to vector<1x2x32xf32>
      tpu.vector_store %arg4[%c0_18, %c0_19, %c0_20], %25 {strides = array<i32>} : memref<1x2x32xf32, #tpu.memory_space<vmem>>, vector<1x2x32xf32>,
    } else {
    }
    return
  }
  func.func @transform_0(%arg0: i32, %arg1: i32) -> (i32, i32, i32) {
    %c1_i32 = arith.constant 1 : i32
    %0 = arith.muli %arg0, %c1_i32 : i32
    %1 = arith.addi %0, %arg1 : i32
    %c0_i32 = arith.constant 0 : i32
    %2 = arith.minsi %1, %c0_i32 : i32
    %c0_i32_0 = arith.constant 0 : i32
    %c0_i32_1 = arith.constant 0 : i32
    %c0_i32_2 = arith.constant 0 : i32
    return %c0_i32_0, %c0_i32_1, %2 : i32, i32, i32
  }
  func.func @transform_1(%arg0: i32, %arg1: i32) -> (i32, i32, i32) {
    %c0_i32 = arith.constant 0 : i32
    %c0_i32_0 = arith.constant 0 : i32
    %c0_i32_1 = arith.constant 0 : i32
    return %arg0, %c0_i32, %c0_i32_0 : i32, i32, i32
  }
  func.func @transform_2(%arg0: i32, %arg1: i32) -> (i32, i32, i32) {
    %c0_i32 = arith.constant 0 : i32
    %c0_i32_0 = arith.constant 0 : i32
    %c0_i32_1 = arith.constant 0 : i32
    return %arg0, %c0_i32, %c0_i32_0 : i32, i32, i32
  }
}

</mosaic_0001>

<bundles_post_ra>
// kernel: channel_attention.3
= control target key start
LH: loop header
LB: loop body
LE: loop exit
PB: predicated region body
PF: predicated region fallthrough
CT: control target
= control target key end

     0   :  { %v276_v3 = vmov 0.0|0.0   ;;  %vm277_vm0 = vmmov 0   ;;  %v278_v6 = vmov 0.0   ;;  %s344_s0 = inlined_call_operand.vmem [shape: f32[2,2,32], index: 0, kind: input, shape index: {}]   ;;  %s345_s1 = inlined_call_operand.vmem [shape: f32[2,2,32], index: 1, kind: input, shape index: {}]   ;;  %s346_s2 = inlined_call_operand.vmem [shape: f32[32,8], index: 2, kind: input, shape index: {}]   ;;  %s347_s3 = inlined_call_operand.vmem [shape: f32[8,32], index: 3, kind: input, shape index: {}]   ;;  %s348_s4 = inlined_call_operand.hbm [shape: f32[2,32], index: 4, kind: output, shape index: {}]  }
   0x1   :  { %v32_v0 = vld [vmem:[%s346_s2] sm:$0xff]  ;;  %v33_v1 = vld [vmem:[%s346_s2 + $0x8] sm:$0xff]  ;;  %v34_v2 = vld [vmem:[%s346_s2 + $0x10] sm:$0xff]  ;;  %238 = vmatprep.subr.bf16.mxu0 %v276_v3  ;;  %230 = vmatprep.mubr.msk.f32.mxu0 %vm277_vm0, %v278_v6 }
   0x2   :  { %v239_v4 = vpack.c.bf16 %v33_v1, %v32_v0  ;;  %v35_v5 = vld [vmem:[%s346_s2 + $0x18] sm:$0xff]  ;;  %v18_v7 = vld [vmem:[%s344_s0] sm:$0x3]  ;;  %v211_v9 = vld [vmem:[%s344_s0 + $0x2] sm:$0x3]  ;;  %233 = vmatprep.subr.mxu1 %v278_v6  ;;  %235 = vmatprep.mubr.msk.f32.mxu1 %vm277_vm0, %v278_v6 }
   0x3   :  { %v19_v8 = vld [vmem:[%s345_s1] sm:$0x3]  ;;  %v212_v10 = vld [vmem:[%s345_s1 + $0x2] sm:$0x3]  ;;  %v242_v11 = vpack.c.bf16 %v35_v5, %v34_v2  ;;  %v22_v12 = vadd.f32 %v211_v9, %v18_v7 }
   0x4   :  { %240 = vmatpush3.bf16.msra.mxu0 %v239_v4  ;;  %v25_v13 = vmax.f32 %v19_v8, %v212_v10 }
   0x5   :  { %9 = vsyncpa [#allocation3], 0  ;;  %241 = vmatprep.subr.bf16.mxu0 %v276_v3  ;;  %vm30_vm1 = vcmask 1041408   ;;  %v26_v14 = vmul.f32 0.001953125, %v22_v12  ;;  %vm36_vm2 = vcmask 261120   ;;  %v111_v17 = vld [vmem:[%s347_s3] sm:$0xff] }
   0x6   :  { %v28_v15 = vrot.slane %v25_v13, 6  ;;  %234 = vmatpush3.msra.mxu1 %v111_v17  ;;  %vm112_vm3 = vcmask 64512   ;;  %s279_s1 = smov [#allocation2]   ;;  %vm195_vm4 = vcmask 254976  }
   0x7   :  { %s203_s5 = sshll.u32 %s279_s1, 4  ;;  %s204_s5 = int_to_ptr.vmem [resolvable:$true] %s203_s5 }
   0x8   :  { %243 = vmatpush3.bf16.msra.mxu0 %v242_v11  ;;  %v31_v16 = vsel %vm30_vm1, %v26_v14, %v28_v15  ;;  %s252_s3 = scalar_lea.vmem %s204_s5, 32  ;;  %p257_p1 = scmp.lt.s32.totalorder %s204_s5, %s204_s5 }
   0x9   :  { %p253_p0 = scmp.ne.s32.totalorder %s204_s5, %s252_s3  ;;  %p258_p2 = scmp.lt.s32.totalorder %s252_s3, %s252_s3 }
   0xb   :  { %231 = vmatmul.mubr.msk.f32.vlgmr.msra.gmra.mrb[0].mxu0 %vm36_vm2, %v31_v16  ;;  %p259_p3 = por %p258_p2, %p257_p1 }
   0xd   :  { %p260_p4 = pnand %p259_p3, %p253_p0 }
  0xde   :  { %v106_v18 = vpop.f32.mrb[0].mxu0 }
  0xdf   :  { %v110_v19 = vmax.f32 %v106_v18, 0.0  ;;  %v232_v20 = vpop.f32.mrb[1].mxu0 }
  0xe1   :  { %236 = vmatmul.mubr.msk.f32.vlgmr.msra.gmra.mrb[0].mxu1 %vm112_vm3, %v110_v19 }
 0x1b4   :  { %v182_v21 = vpop.f32.mrb[0].mxu1 }
 0x1b5   :  { %v187_v22 = vrot.slane %v182_v21, 2  ;;  %v237_v23 = vpop.f32.mrb[1].mxu1 }
 0x1b7   :  { %v189_v24 = vadd.f32 %v187_v22, %v182_v21 }
 0x1b9   :  { %v190_v25 = vsub.f32 0.0, %v189_v24 }
 0x1bb   :  { %v191_v26 = vmul.f32 1.442695, %v190_v25 }
 0x1bd   :  { %248 = vpow2.f32 %v191_v26 }
 0x1c7   :  { %v249_v27 = vpop.eup %248 }
 0x1c8   :  { %v193_v28 = vadd.f32 1.0, %v249_v27 }
 0x1ca   :  { %250 = vrcp.f32 %v193_v28 }
 0x1d4   :  { %v251_v29 = vpop.eup %250 }
 0x1d5   :  { %196 = vst.msk [vmem:[#allocation2] sm:$0x3] %vm195_vm4, %v251_v29 }
 0x1d6   :  { %263 = shalt.err (!%p260_p4)
}
 0x1d7   :  { %s264_s8 = scalar_lea.hbm %s348_s4, 32 }
 0x1d8   :  { %p265_p5 = scmp.ne.s32.totalorder %s348_s4, %s264_s8  ;;  %p268_p6 = scmp.lt.u32.totalorder %s264_s8, %s348_s4 }
 0x1da   :  { %p270_p7 = pnand %p268_p6, %p265_p5 }
 0x1dc   :  { %273 = shalt.err (!%p270_p7)
}
 0x1dd   :  { %206 = dma.vmem_to_hbm [thread:$0]  %s204_s5, 32, %s348_s4, [#allocation3]  }
 0x1de   :  { %274 = dma.done.wait [#allocation3], 32  }
 0x1df   :  { %275 = vsyncadd [#allocation3], 4294967264 }
 0x1e0   :  { %210 = vsyncpa [#allocation3], 1 }

// kernel: channel_attention.2
= control target key start
LH: loop header
LB: loop body
LE: loop exit
PB: predicated region body
PF: predicated region fallthrough
CT: control target
= control target key end

     0   :  { %s887_s9 = smov 0   ;;  %s889_s10 = smov 0   ;;  %s1362_s0 = inlined_call_operand.vmem [shape: f32[2,32,512], index: 0, kind: input, shape index: {}]   ;;  %s1363_s1 = inlined_call_operand.vmem [shape: f32[2,2,32], index: 1, kind: output, shape index: {0}]   ;;  %s1364_s2 = inlined_call_operand.vmem [shape: f32[2,2,32], index: 2, kind: output, shape index: {1}]  }
   0x1   :  { %s891_s11 = smov 0  }
   0x2 LB: > { %s25_s12 = sadd.s32 1, %s864_s10  ;;  %p810_p0 = scmp.ge.s32.totalorder %s868_s11, 1  ;;  %s868_s11 = sphi %s891_s11, %s13_s11   ;;  %s864_s10 = sphi %s889_s10, %s1366_s10   ;;  %s860_s9 = sphi %s887_s9, %s1365_s9  }
   0x3   : > { %p27_p1 = scmp.ge.s32.totalorder %s25_s12, 2  ;;  %p140_p2 = scmp.lt.s32.totalorder %s868_s11, 3 }
   0x5   : > { %s1368_s12 = smov (%p27_p1, %s25_s12), 0  ;;  %p141_p3 = pnand %p810_p0, %p140_p2 }
   0x6   : > { %p169_p4 = scmp.lt.s32.totalorder (!%p141_p3), %s860_s9, 0  ;;  %p180_p5 = scmp.lt.s32.totalorder (!%p141_p3), %s860_s9, 1  ;;  %vm192_vm0 = vcmask (!%p141_p3), 254976   ;;  %v870_v0 = vmov (!%p141_p3), 0.0   ;;  %v871_v1 = vmov (!%p141_p3), -inf  }
   0x7   : > { %144 = sbr.rel (%p141_p3) target bundleno = 413 (0x19d), region = 24  ;;  %193 = vst.msk [vmem:[#allocation2] sm:$0x3] (!%p141_p3), %vm192_vm0, %v870_v0  ;;  %194 = vst.msk [vmem:[#allocation3] sm:$0x3] (!%p141_p3), %vm192_vm0, %v871_v1  ;;  %s815_s13 = sshll.u32 (!%p141_p3), %s860_s9, 9 }
   0x8   : > { %s916_s17 = sadd.s32 (!%p141_p3), 512, %s815_s13 }
   0x9   : > { %p816_p7 = scmp.gt.s32.totalorder (!%p141_p3), %s916_s17, 512 }
   0xe   : > { %s170_s14 = scalar_select %p169_p4, %s860_s9, 0 }
   0xf   : > { %s181_s15 = scalar_select %p180_p5, %s860_s9, 1 }
  0x10   : > { %s811_s16 = sshll.u32 %s170_s14, 2  ;;  %vm294_vm1 = vcmask (!%p816_p7), 130112   ;;  %vm301_vm2 = vcmask (!%p816_p7), 195712   ;;  %vm308_vm3 = vcmask (!%p816_p7), 261312   ;;  %vm329_vm4 = vcmask (!%p816_p7), 1041409  }
  0x11   : > { %p172_p6 = scmp.lt.s32.totalorder %s811_s16, 3  ;;  %s813_s18 = sshll.u32 %s181_s15, 1 }
  0x12   : > { %s921_s21 = scalar_lea.vmem %s1363_s1, %s813_s18  ;;  %s926_s24 = scalar_lea.vmem %s1364_s2, %s813_s18 }
  0x13   : > { %s1370_s16 = smov (!%p172_p6, %s811_s16), 3 }
  0x14   : > { %s812_s25 = sshll.u32 %s1370_s16, 3 }
  0x15   : > { %s931_s28 = scalar_lea.vmem %s1362_s0, %s812_s25 }
  0x16   : > { %v934_v2 = vld [vmem:[%s931_s28] sm:$0xff]  ;;  %v937_v3 = vld [vmem:[%s931_s28 + $0x8] sm:$0xff]  ;;  %v940_v4 = vld [vmem:[%s931_s28 + $0x10] sm:$0xff] }
  0x17   : > { %v943_v5 = vld [vmem:[%s931_s28 + $0x18] sm:$0xff]  ;;  %v946_v6 = vld [vmem:[%s931_s28 + $0x20] sm:$0xff]  ;;  %v949_v7 = vld [vmem:[%s931_s28 + $0x28] sm:$0xff]  ;;  %v235_v35 = vadd.f32 (!%p816_p7), %v937_v3, %v934_v2  ;;  %v336_v39 = vmax.f32 (!%p816_p7), %v934_v2, %v937_v3 }
  0x18   : > { %v952_v8 = vld [vmem:[%s931_s28 + $0x30] sm:$0xff]  ;;  %v955_v9 = vld [vmem:[%s931_s28 + $0x38] sm:$0xff]  ;;  %v958_v10 = vld [vmem:[%s931_s28 + $0x40] sm:$0xff]  ;;  %v240_v37 = vadd.f32 (!%p816_p7), %v949_v7, %v946_v6  ;;  %v341_v38 = vmax.f32 (!%p816_p7), %v946_v6, %v949_v7 }
  0x19   : > { %v961_v11 = vld [vmem:[%s931_s28 + $0x48] sm:$0xff]  ;;  %v964_v12 = vld [vmem:[%s931_s28 + $0x50] sm:$0xff]  ;;  %v967_v13 = vld [vmem:[%s931_s28 + $0x58] sm:$0xff]  ;;  %v236_v41 = vadd.f32 (!%p816_p7), %v235_v35, %v940_v4  ;;  %v337_v51 = vmax.f32 (!%p816_p7), %v336_v39, %v940_v4 }
  0x1a   : > { %v970_v14 = vld [vmem:[%s931_s28 + $0x60] sm:$0xff]  ;;  %v973_v15 = vld [vmem:[%s931_s28 + $0x68] sm:$0xff]  ;;  %v976_v16 = vld [vmem:[%s931_s28 + $0x70] sm:$0xff]  ;;  %233 = sbr.rel (%p816_p7) target bundleno = 211 (0xd3), region = 32  ;;  %v241_v43 = vadd.f32 (!%p816_p7), %v240_v37, %v952_v8  ;;  %v342_v46 = vmax.f32 (!%p816_p7), %v341_v38, %v952_v8  ;;  %v245_v57 = vadd.f32 (!%p816_p7), %v961_v11, %v958_v10  ;;  %v346_v63 = vmax.f32 (!%p816_p7), %v958_v10, %v961_v11 }
  0x1b   : > { %v979_v17 = vld [vmem:[%s931_s28 + $0x78] sm:$0xff]  ;;  %v982_v18 = vld [vmem:[%s931_s28 + $0x80] sm:$0xff]  ;;  %v985_v19 = vld [vmem:[%s931_s28 + $0x88] sm:$0xff]  ;;  %v237_v45 = vadd.f32 (!%p816_p7), %v236_v41, %v943_v5  ;;  %v338_v55 = vmax.f32 (!%p816_p7), %v337_v51, %v943_v5 }
  0x1c   : > { %v988_v20 = vld [vmem:[%s931_s28 + $0x90] sm:$0xff]  ;;  %v991_v21 = vld [vmem:[%s931_s28 + $0x98] sm:$0xff]  ;;  %v994_v22 = vld [vmem:[%s931_s28 + $0xa0] sm:$0xff]  ;;  %v255_v34 = vadd.f32 (!%p816_p7), %v985_v19, %v982_v18  ;;  %v356_v48 = vmax.f32 (!%p816_p7), %v982_v18, %v985_v19  ;;  %v242_v50 = vadd.f32 (!%p816_p7), %v241_v43, %v955_v9  ;;  %v343_v52 = vmax.f32 (!%p816_p7), %v342_v46, %v955_v9 }
  0x1d   : > { %v997_v23 = vld [vmem:[%s931_s28 + $0xa8] sm:$0xff]  ;;  %v1000_v24 = vld [vmem:[%s931_s28 + $0xb0] sm:$0xff]  ;;  %v1003_v25 = vld [vmem:[%s931_s28 + $0xb8] sm:$0xff]  ;;  %238 = vadd.xlane.f32.xlu0 (!%p816_p7), %v237_v45  ;;  %v246_v62 = vadd.f32 (!%p816_p7), %v245_v57, %v964_v12  ;;  %v347_v37 = vmax.f32 (!%p816_p7), %v346_v63, %v964_v12 }
  0x1e   : > { %v1006_v26 = vld [vmem:[%s931_s28 + $0xc0] sm:$0xff]  ;;  %v1009_v27 = vld [vmem:[%s931_s28 + $0xc8] sm:$0xff]  ;;  %v1012_v28 = vld [vmem:[%s931_s28 + $0xd0] sm:$0xff]  ;;  %v260_v36 = vadd.f32 (!%p816_p7), %v997_v23, %v994_v22  ;;  %v256_v40 = vadd.f32 (!%p816_p7), %v255_v34, %v988_v20  ;;  %v361_v47 = vmax.f32 (!%p816_p7), %v994_v22, %v997_v23  ;;  %v357_v54 = vmax.f32 (!%p816_p7), %v356_v48, %v988_v20 }
  0x1f   : > { %v1015_v29 = vld [vmem:[%s931_s28 + $0xd8] sm:$0xff]  ;;  %v1018_v30 = vld [vmem:[%s931_s28 + $0xe0] sm:$0xff]  ;;  %v1021_v31 = vld [vmem:[%s931_s28 + $0xe8] sm:$0xff]  ;;  %v265_v56 = vadd.f32 (!%p816_p7), %v1009_v27, %v1006_v26  ;;  %v366_v60 = vmax.f32 (!%p816_p7), %v1006_v26, %v1009_v27  ;;  %v250_v34 = vadd.f32 (!%p816_p7), %v973_v15, %v970_v14 }
  0x20   : > { %v1024_v32 = vld [vmem:[%s931_s28 + $0xf0] sm:$0xff]  ;;  %v1027_v33 = vld [vmem:[%s931_s28 + $0xf8] sm:$0xff]  ;;  %v261_v42 = vadd.f32 (!%p816_p7), %v260_v36, %v1000_v24  ;;  %v257_v44 = vadd.f32 (!%p816_p7), %v256_v40, %v991_v21  ;;  %v362_v53 = vmax.f32 (!%p816_p7), %v361_v47, %v1000_v24  ;;  %v358_v59 = vmax.f32 (!%p816_p7), %v357_v54, %v991_v21 }
  0x21   : > { %243 = vadd.xlane.f32.xlu0 %v242_v50  ;;  %v266_v61 = vadd.f32 %v265_v56, %v1012_v28  ;;  %v367_v0 = vmax.f32 %v366_v60, %v1012_v28  ;;  %v270_v1 = vadd.f32 %v1021_v31, %v1018_v30  ;;  %v247_v36 = vadd.f32 %v246_v62, %v967_v13 }
  0x22   : > { %258 = vadd.xlane.f32.xlu1 %v257_v44  ;;  %v262_v49 = vadd.f32 %v261_v42, %v1003_v25  ;;  %v363_v58 = vmax.f32 %v362_v53, %v1003_v25  ;;  %v371_v39 = vmax.f32 %v1018_v30, %v1021_v31  ;;  %v351_v40 = vmax.f32 %v970_v14, %v973_v15 }
  0x23   : > { %v267_v35 = vadd.f32 %v266_v61, %v1015_v29  ;;  %v271_v38 = vadd.f32 %v270_v1, %v1024_v32  ;;  %v368_v41 = vmax.f32 %v367_v0, %v1015_v29  ;;  %v348_v42 = vmax.f32 %v347_v37, %v967_v13 }
  0x24   : > { %v251_v43 = vadd.f32 %v250_v34, %v976_v16  ;;  %v372_v44 = vmax.f32 %v371_v39, %v1024_v32  ;;  %v352_v47 = vmax.f32 %v351_v40, %v976_v16  ;;  %v283_v54 = vlaneseq }
  0x25   : > { %339 = vmax.xlane.f32.xlu0 %v338_v55  ;;  %v272_v45 = vadd.f32 %v271_v38, %v1027_v33 }
  0x26   : > { %263 = vadd.xlane.f32.xlu1 %v262_v49  ;;  %v252_v46 = vadd.f32 %v251_v43, %v979_v17  ;;  %v373_v48 = vmax.f32 %v372_v44, %v1027_v33  ;;  %v353_v49 = vmax.f32 %v352_v47, %v979_v17  ;;  %v284_v57 = vand.u32 127, %v283_v54 }
  0x27   : > { %v286_v61 = vshrl.u32 %v283_v54, 7 }
  0x28   : > { %v296_v62 = vadd.s32 4294967280, %v284_v57  ;;  %v303_v34 = vadd.s32 4294967272, %v284_v57 }
  0x29   : > { %359 = vmax.xlane.f32.xlu0 %v358_v59 }
  0x2a   : > { %344 = vmax.xlane.f32.xlu1 %v343_v52 }
  0x2d   : > { %248 = vadd.xlane.f32.xlu0 %v247_v36  ;;  %v299_v36 = vsub.s32 %v296_v62, %v286_v61 }
  0x2e   : > { %364 = vmax.xlane.f32.xlu1 %v363_v58  ;;  %v289_v58 = vadd.s32 4294967288, %v284_v57 }
  0x30   : > { %v292_v63 = vsub.s32 %v289_v58, %v286_v61 }
  0x31   : > { %349 = vmax.xlane.f32.xlu0 %v348_v42 }
  0x32   : > { %268 = vadd.xlane.f32.xlu1 %v267_v35  ;;  %v287_v35 = vsub.s32 %v284_v57, %v286_v61 }
  0x35   : > { %253 = vadd.xlane.f32.xlu0 %v252_v46 }
  0x36   : > { %369 = vmax.xlane.f32.xlu1 %v368_v41  ;;  %v306_v41 = vsub.s32 %v303_v34, %v286_v61 }
  0x39   : > { %354 = vmax.xlane.f32.xlu0 %v353_v49 }
  0x3a   : > { %273 = vadd.xlane.f32.xlu1 %v272_v45 }
  0x3e   : > { %374 = vmax.xlane.f32.xlu1 %v373_v48 }
  0xaa   : > { %v239_v51 = vpop.xlane.xlu0 %238 }
  0xab   : > { %v288_v43 = vrot.slane %v239_v51, %v287_v35 }
  0xae   : > { %v244_v53 = vpop.xlane.xlu0 %243 }
  0xaf   : > { %v259_v50 = vpop.xlane.xlu1 %258  ;;  %v293_v38 = vrot.slane %v244_v53, %v292_v63 }
  0xb0   : > { %v313_v42 = vrot.slane %v259_v50, %v287_v35 }
  0xb1   : > { %v295_v47 = vsel %vm294_vm1, %v293_v38, %v288_v43 }
  0xb2   : > { %v340_v56 = vpop.xlane.xlu0 %339 }
  0xb3   : > { %v264_v52 = vpop.xlane.xlu1 %263  ;;  %v387_v49 = vrot.slane %v340_v56, %v287_v35 }
  0xb4   : > { %v317_v37 = vrot.slane %v264_v52, %v292_v63 }
  0xb6   : > { %v360_v60 = vpop.xlane.xlu0 %359  ;;  %v318_v46 = vsel %vm294_vm1, %v317_v37, %v313_v42 }
  0xb7   : > { %v345_v55 = vpop.xlane.xlu1 %344  ;;  %v406_v57 = vrot.slane %v360_v60, %v287_v35 }
  0xb8   : > { %v391_v48 = vrot.slane %v345_v55, %v292_v63 }
  0xba   : > { %v249_v1 = vpop.xlane.xlu0 %248  ;;  %v392_v55 = vsel %vm294_vm1, %v391_v48, %v387_v49 }
  0xbb   : > { %v365_v59 = vpop.xlane.xlu1 %364  ;;  %v300_v45 = vrot.slane %v249_v1, %v299_v36  ;;  %v234_v1 = vld [vmem:[#allocation2] sm:$0x3] }
  0xbc   : > { %v410_v53 = vrot.slane %v365_v59, %v292_v63 }
  0xbd   : > { %v302_v51 = vsel %vm301_vm2, %v300_v45, %v295_v47 }
  0xbe   : > { %v350_v40 = vpop.xlane.xlu0 %349  ;;  %v411_v60 = vsel %vm294_vm1, %v410_v53, %v406_v57 }
  0xbf   : > { %v269_v0 = vpop.xlane.xlu1 %268 }
  0xc0   : > { %v322_v44 = vrot.slane %v269_v0, %v299_v36  ;;  %v396_v0 = vrot.slane %v350_v40, %v299_v36 }
  0xc2   : > { %v254_v52 = vpop.xlane.xlu0 %253  ;;  %v323_v50 = vsel %vm301_vm2, %v322_v44, %v318_v46 }
  0xc3   : > { %v370_v39 = vpop.xlane.xlu1 %369  ;;  %v307_v62 = vrot.slane %v254_v52, %v306_v41 }
  0xc4   : > { %v415_v61 = vrot.slane %v370_v39, %v299_v36  ;;  %v397_v36 = vsel %vm301_vm2, %v396_v0, %v392_v55  ;;  %v335_v39 = vld [vmem:[#allocation3] sm:$0x3] }
  0xc5   : > { %v309_v37 = vsel %vm308_vm3, %v307_v62, %v302_v51 }
  0xc6   : > { %v355_v59 = vpop.xlane.xlu0 %354  ;;  %v416_v43 = vsel %vm301_vm2, %v415_v61, %v411_v60 }
  0xc7   : > { %v274_v54 = vpop.xlane.xlu1 %273  ;;  %v401_v42 = vrot.slane %v355_v59, %v306_v41 }
  0xc8   : > { %v327_v58 = vrot.slane %v274_v54, %v306_v41 }
  0xc9   : > { %v402_v44 = vsel %vm308_vm3, %v401_v42, %v397_v36 }
  0xca   : > { %v328_v34 = vsel %vm308_vm3, %v327_v58, %v323_v50 }
  0xcb   : > { %v330_v56 = vsel %vm329_vm4, %v328_v34, %v309_v37  ;;  %v375_v38 = vpop.xlane.xlu1 %374 }
  0xcc   : > { %v332_v63 = vadd.f32 %v330_v56, %v234_v1  ;;  %v420_v35 = vrot.slane %v375_v38, %v306_v41 }
  0xce   : > { %334 = vst.msk [vmem:[#allocation2] sm:$0x3] %vm192_vm0, %v332_v63  ;;  %v421_v40 = vsel %vm308_vm3, %v420_v35, %v416_v43 }
  0xcf   : > { %v422_v45 = vsel %vm329_vm4, %v421_v40, %v402_v44 }
  0xd0   : > { %v424_v46 = vmax.f32 %v335_v39, %v422_v45 }
  0xd2   : > { %425 = vst.msk [vmem:[#allocation3] sm:$0x3] %vm192_vm0, %v424_v46 }
  0xd3 PF: > { %p817_p8 = scmp.le.s32.totalorder %s916_s17, 512 }
  0xd4   : > { %v430_v41 = vlaneseq (!%p817_p8)  ;;  %v435_v47 = vstv (!%p817_p8), %s815_s13  ;;  %vm542_vm9 = vcmask (!%p817_p8), 130112   ;;  %vm549_vm10 = vcmask (!%p817_p8), 195712  }
  0xd5   : > { %429 = sbr.rel (%p817_p8) target bundleno = 405 (0x195), region = 36  ;;  %vm556_vm11 = vcmask (!%p817_p8), 261312   ;;  %vm577_vm12 = vcmask (!%p817_p8), 1041409  }
  0xd6   : > { %v1113_v48 = vand.u32 (!%p817_p8), 127, %v430_v41  ;;  %v1115_v49 = vshrl.u32 (!%p817_p8), %v430_v41, 7 }
  0xd8   : > { %v432_v54 = vadd.s32 (!%p817_p8), 128, %v1113_v48  ;;  %v433_v52 = vadd.s32 (!%p817_p8), 256, %v1113_v48  ;;  %v434_v53 = vadd.s32 (!%p817_p8), 384, %v1113_v48  ;;  %v1121_v57 = vadd.s32 (!%p817_p8), %v435_v47, %v1113_v48 }
  0xd9   : > { %v1125_v58 = vsub.s32 (!%p817_p8), %v1113_v48, %v1115_v49 }
  0xda   : > { %v1127_v62 = vadd.s32 (!%p817_p8), %v435_v47, %v432_v54  ;;  %v1129_v50 = vadd.s32 (!%p817_p8), %v435_v47, %v433_v52  ;;  %v1131_v51 = vadd.s32 (!%p817_p8), %v435_v47, %v434_v53  ;;  %vm440_vm5 = vcmp.lt.s32.totalorder (!%p817_p8), %v1121_v57, 512 }
  0xdb   : > { %v469_v61 = vsel (!%p817_p8), %vm440_vm5, %v982_v18, 0.0  ;;  %v453_v0 = vsel (!%p817_p8), %vm440_vm5, %v934_v2, 0.0  ;;  %v473_v1 = vsel (!%p817_p8), %vm440_vm5, %v994_v22, 0.0  ;;  %v457_v34 = vsel (!%p817_p8), %vm440_vm5, %v946_v6, 0.0 }
  0xdc   : > { %vm441_vm6 = vcmp.lt.s32.totalorder %v1127_v62, 512  ;;  %vm442_vm7 = vcmp.lt.s32.totalorder %v1129_v50, 512  ;;  %vm443_vm8 = vcmp.lt.s32.totalorder %v1131_v51, 512  ;;  %v588_v37 = vsel %vm440_vm5, %v946_v6, -inf }
  0xdd   : > { %v470_v55 = vsel %vm441_vm6, %v985_v19, 0.0  ;;  %v471_v56 = vsel %vm442_vm7, %v988_v20, 0.0  ;;  %v472_v38 = vsel %vm443_vm8, %v991_v21, 0.0  ;;  %v454_v59 = vsel %vm441_vm6, %v937_v3, 0.0 }
  0xde   : > { %v505_v60 = vadd.f32 %v470_v55, %v469_v61  ;;  %v455_v6 = vsel %vm442_vm7, %v940_v4, 0.0  ;;  %v456_v63 = vsel %vm443_vm8, %v943_v5, 0.0  ;;  %v485_v35 = vadd.f32 %v454_v59, %v453_v0 }
  0xdf   : > { %v474_v42 = vsel %vm441_vm6, %v997_v23, 0.0  ;;  %v475_v43 = vsel %vm442_vm7, %v1000_v24, 0.0  ;;  %v476_v36 = vsel %vm443_vm8, %v1003_v25, 0.0  ;;  %v458_v39 = vsel %vm441_vm6, %v949_v7, 0.0 }
  0xe0   : > { %v506_v40 = vadd.f32 %v505_v60, %v471_v56  ;;  %v486_v44 = vadd.f32 %v485_v35, %v455_v6  ;;  %v510_v45 = vadd.f32 %v474_v42, %v473_v1  ;;  %v459_v46 = vsel %vm442_vm7, %v952_v8, 0.0 }
  0xe1   : > { %v460_v41 = vsel %vm443_vm8, %v955_v9, 0.0  ;;  %v490_v47 = vadd.f32 %v458_v39, %v457_v34  ;;  %v589_v54 = vsel %vm441_vm6, %v949_v7, -inf  ;;  %v590_v52 = vsel %vm442_vm7, %v952_v8, -inf }
  0xe2   : > { %v507_v53 = vadd.f32 %v506_v40, %v472_v38  ;;  %v487_v61 = vadd.f32 %v486_v44, %v456_v63  ;;  %v511_v0 = vadd.f32 %v510_v45, %v475_v43  ;;  %v591_v1 = vsel %vm443_vm8, %v955_v9, -inf }
  0xe3   : > { %v491_v55 = vadd.f32 %v490_v47, %v459_v46  ;;  %v621_v56 = vmax.f32 %v588_v37, %v589_v54  ;;  %v584_v34 = vsel %vm440_vm5, %v934_v2, -inf  ;;  %v585_v7 = vsel %vm441_vm6, %v937_v3, -inf }
  0xe4   : > { %508 = vadd.xlane.f32.xlu1 %v507_v53  ;;  %488 = vadd.xlane.f32.xlu0 %v487_v61  ;;  %v512_v8 = vadd.f32 %v511_v0, %v476_v36  ;;  %v586_v38 = vsel %vm442_vm7, %v940_v4, -inf  ;;  %v587_v9 = vsel %vm443_vm8, %v943_v5, -inf  ;;  %v616_v37 = vmax.f32 %v584_v34, %v585_v7 }
  0xe5   : > { %v492_v59 = vadd.f32 %v491_v55, %v460_v41  ;;  %v622_v60 = vmax.f32 %v621_v56, %v590_v52  ;;  %v604_v2 = vsel %vm440_vm5, %v994_v22, -inf  ;;  %v605_v3 = vsel %vm441_vm6, %v997_v23, -inf }
  0xe6   : > { %v617_v6 = vmax.f32 %v616_v37, %v586_v38  ;;  %v606_v4 = vsel %vm442_vm7, %v1000_v24, -inf  ;;  %v641_v63 = vmax.f32 %v604_v2, %v605_v3  ;;  %v600_v5 = vsel %vm440_vm5, %v982_v18, -inf }
  0xe7   : > { %v623_v35 = vmax.f32 %v622_v60, %v591_v1  ;;  %v601_v42 = vsel %vm441_vm6, %v985_v19, -inf  ;;  %v602_v22 = vsel %vm442_vm7, %v988_v20, -inf  ;;  %v607_v24 = vsel %vm443_vm8, %v1003_v25, -inf }
  0xe8   : > { %513 = vadd.xlane.f32.xlu1 %v512_v8  ;;  %493 = vadd.xlane.f32.xlu0 %v492_v59  ;;  %v618_v23 = vmax.f32 %v617_v6, %v587_v9  ;;  %v642_v43 = vmax.f32 %v641_v63, %v606_v4  ;;  %v636_v36 = vmax.f32 %v600_v5, %v601_v42  ;;  %v603_v18 = vsel %vm443_vm8, %v991_v21, -inf }
  0xe9   : > { %v477_v19 = vsel %vm440_vm5, %v1006_v26, 0.0  ;;  %v478_v20 = vsel %vm441_vm6, %v1009_v27, 0.0  ;;  %v479_v39 = vsel %vm442_vm7, %v1012_v28, 0.0  ;;  %v480_v25 = vsel %vm443_vm8, %v1015_v29, 0.0 }
  0xea   : > { %v637_v40 = vmax.f32 %v636_v36, %v602_v22  ;;  %v515_v44 = vadd.f32 %v478_v20, %v477_v19  ;;  %v461_v21 = vsel %vm440_vm5, %v958_v10, 0.0  ;;  %v643_v45 = vmax.f32 %v642_v43, %v607_v24 }
  0xeb   : > { %v462_v46 = vsel %vm441_vm6, %v961_v11, 0.0  ;;  %v463_v41 = vsel %vm442_vm7, %v964_v12, 0.0  ;;  %v608_v47 = vsel %vm440_vm5, %v1006_v26, -inf  ;;  %v609_v61 = vsel %vm441_vm6, %v1009_v27, -inf }
  0xec   : > { %624 = vmax.xlane.f32.xlu1 %v623_v35  ;;  %619 = vmax.xlane.f32.xlu0 %v618_v23  ;;  %v638_v54 = vmax.f32 %v637_v40, %v603_v18  ;;  %v516_v52 = vadd.f32 %v515_v44, %v479_v39  ;;  %v495_v53 = vadd.f32 %v462_v46, %v461_v21  ;;  %v464_v0 = vsel %vm443_vm8, %v967_v13, 0.0 }
  0xed   : > { %v610_v1 = vsel %vm442_vm7, %v1012_v28, -inf  ;;  %v646_v55 = vmax.f32 %v608_v47, %v609_v61  ;;  %v592_v26 = vsel %vm440_vm5, %v958_v10, -inf  ;;  %v593_v34 = vsel %vm441_vm6, %v961_v11, -inf }
  0xee   : > { %v496_v56 = vadd.f32 %v495_v53, %v463_v41  ;;  %v594_v27 = vsel %vm442_vm7, %v964_v12, -inf  ;;  %v611_v7 = vsel %vm443_vm8, %v1015_v29, -inf  ;;  %v626_v28 = vmax.f32 %v592_v26, %v593_v34 }
  0xef   : > { %v647_v8 = vmax.f32 %v646_v55, %v610_v1  ;;  %v481_v38 = vsel %vm440_vm5, %v1018_v30, 0.0  ;;  %v517_v10 = vadd.f32 %v516_v52, %v480_v25  ;;  %v482_v11 = vsel %vm441_vm6, %v1021_v31, 0.0 }
  0xf0   : > { %644 = vmax.xlane.f32.xlu1 %v643_v45  ;;  %639 = vmax.xlane.f32.xlu0 %v638_v54  ;;  %v497_v9 = vadd.f32 %v496_v56, %v464_v0  ;;  %v483_v12 = vsel %vm442_vm7, %v1024_v32, 0.0  ;;  %v595_v29 = vsel %vm443_vm8, %v967_v13, -inf  ;;  %v627_v37 = vmax.f32 %v626_v28, %v594_v27 }
  0xf1   : > { %v520_v59 = vadd.f32 %v482_v11, %v481_v38  ;;  %v465_v60 = vsel %vm440_vm5, %v970_v14, 0.0  ;;  %v484_v2 = vsel %vm443_vm8, %v1027_v33, 0.0  ;;  %v466_v3 = vsel %vm441_vm6, %v973_v15, 0.0 }
  0xf2   : > { %v467_v6 = vsel %vm442_vm7, %v976_v16, 0.0  ;;  %v612_v13 = vsel %vm440_vm5, %v1018_v30, -inf  ;;  %v648_v4 = vmax.f32 %v647_v8, %v611_v7  ;;  %v500_v35 = vadd.f32 %v466_v3, %v465_v60 }
  0xf3   : > { %v521_v63 = vadd.f32 %v520_v59, %v483_v12  ;;  %v613_v5 = vsel %vm441_vm6, %v1021_v31, -inf  ;;  %v628_v42 = vmax.f32 %v627_v37, %v595_v29  ;;  %v614_v22 = vsel %vm442_vm7, %v1024_v32, -inf }
  0xf4   : > { %518 = vadd.xlane.f32.xlu1 %v517_v10  ;;  %498 = vadd.xlane.f32.xlu0 %v497_v9  ;;  %v651_v23 = vmax.f32 %v612_v13, %v613_v5  ;;  %v596_v24 = vsel %vm440_vm5, %v970_v14, -inf  ;;  %v468_v30 = vsel %vm443_vm8, %v979_v17, 0.0  ;;  %v501_v43 = vadd.f32 %v500_v35, %v467_v6  ;;  %v444_v13 = vld [vmem:[#allocation2] sm:$0x3] }
  0xf5   : > { %v597_v31 = vsel %vm441_vm6, %v973_v15, -inf  ;;  %v598_v36 = vsel %vm442_vm7, %v976_v16, -inf  ;;  %v537_v32 = vadd.s32 4294967288, %v1113_v48  ;;  %v522_v19 = vadd.f32 %v521_v63, %v484_v2 }
  0xf6   : > { %v631_v18 = vmax.f32 %v596_v24, %v597_v31  ;;  %v652_v20 = vmax.f32 %v651_v23, %v614_v22  ;;  %v502_v14 = vadd.f32 %v501_v43, %v468_v30  ;;  %v615_v62 = vsel %vm443_vm8, %v1027_v33, -inf  ;;  %v583_v30 = vld [vmem:[#allocation3] sm:$0x3] }
  0xf7   : > { %v540_v39 = vsub.s32 %v537_v32, %v1115_v49  ;;  %v599_v15 = vsel %vm443_vm8, %v979_v17, -inf  ;;  %v544_v40 = vadd.s32 4294967280, %v1113_v48  ;;  %v551_v44 = vadd.s32 4294967272, %v1113_v48 }
  0xf8   : > { %649 = vmax.xlane.f32.xlu1 %v648_v4  ;;  %629 = vmax.xlane.f32.xlu0 %v628_v42  ;;  %v632_v57 = vmax.f32 %v631_v18, %v598_v36  ;;  %v653_v16 = vmax.f32 %v652_v20, %v615_v62 }
  0xf9   : > { %v547_v25 = vsub.s32 %v544_v40, %v1115_v49  ;;  %v554_v21 = vsub.s32 %v551_v44, %v1115_v49 }
  0xfa   : > { %v633_v50 = vmax.f32 %v632_v57, %v599_v15 }
  0xfc   : > { %523 = vadd.xlane.f32.xlu1 %v522_v19  ;;  %503 = vadd.xlane.f32.xlu0 %v502_v14 }
 0x100   : > { %654 = vmax.xlane.f32.xlu1 %v653_v16  ;;  %634 = vmax.xlane.f32.xlu0 %v633_v50 }
 0x171   : > { %v509_v45 = vpop.xlane.xlu1 %508  ;;  %v489_v33 = vpop.xlane.xlu0 %488 }
 0x172   : > { %v561_v17 = vrot.slane %v509_v45, %v1125_v58  ;;  %v536_v41 = vrot.slane %v489_v33, %v1125_v58 }
 0x175   : > { %v514_v46 = vpop.xlane.xlu1 %513  ;;  %v494_v51 = vpop.xlane.xlu0 %493 }
 0x176   : > { %v565_v47 = vrot.slane %v514_v46, %v540_v39  ;;  %v541_v54 = vrot.slane %v494_v51, %v540_v39 }
 0x178   : > { %v566_v52 = vsel %vm542_vm9, %v565_v47, %v561_v17  ;;  %v543_v53 = vsel %vm542_vm9, %v541_v54, %v536_v41 }
 0x179   : > { %v625_v61 = vpop.xlane.xlu1 %624  ;;  %v620_v0 = vpop.xlane.xlu0 %619 }
 0x17a   : > { %v671_v48 = vrot.slane %v625_v61, %v540_v39  ;;  %v667_v49 = vrot.slane %v620_v0, %v1125_v58 }
 0x17c   : > { %v672_v1 = vsel %vm542_vm9, %v671_v48, %v667_v49 }
 0x17d   : > { %v645_v55 = vpop.xlane.xlu1 %644  ;;  %v640_v26 = vpop.xlane.xlu0 %639 }
 0x17e   : > { %v690_v56 = vrot.slane %v645_v55, %v540_v39  ;;  %v686_v34 = vrot.slane %v640_v26, %v1125_v58 }
 0x180   : > { %v691_v27 = vsel %vm542_vm9, %v690_v56, %v686_v34 }
 0x181   : > { %v519_v7 = vpop.xlane.xlu1 %518  ;;  %v499_v8 = vpop.xlane.xlu0 %498 }
 0x182   : > { %v570_v28 = vrot.slane %v519_v7, %v547_v25  ;;  %v548_v38 = vrot.slane %v499_v8, %v547_v25 }
 0x184   : > { %v571_v10 = vsel %vm549_vm10, %v570_v28, %v566_v52  ;;  %v550_v9 = vsel %vm549_vm10, %v548_v38, %v543_v53 }
 0x185   : > { %v650_v11 = vpop.xlane.xlu1 %649  ;;  %v630_v12 = vpop.xlane.xlu0 %629 }
 0x186   : > { %v695_v29 = vrot.slane %v650_v11, %v547_v25  ;;  %v676_v37 = vrot.slane %v630_v12, %v547_v25 }
 0x188   : > { %v696_v59 = vsel %vm549_vm10, %v695_v29, %v691_v27  ;;  %v677_v60 = vsel %vm549_vm10, %v676_v37, %v672_v1 }
 0x189   : > { %v524_v2 = vpop.xlane.xlu1 %523  ;;  %v504_v3 = vpop.xlane.xlu0 %503 }
 0x18a   : > { %v575_v6 = vrot.slane %v524_v2, %v554_v21  ;;  %v555_v58 = vrot.slane %v504_v3, %v554_v21 }
 0x18c   : > { %v576_v4 = vsel %vm556_vm11, %v575_v6, %v571_v10  ;;  %v557_v63 = vsel %vm556_vm11, %v555_v58, %v550_v9 }
 0x18d   : > { %v578_v35 = vsel %vm577_vm12, %v576_v4, %v557_v63  ;;  %v655_v5 = vpop.xlane.xlu1 %654  ;;  %v635_v42 = vpop.xlane.xlu0 %634 }
 0x18e   : > { %v580_v22 = vadd.f32 %v578_v35, %v444_v13  ;;  %v700_v23 = vrot.slane %v655_v5, %v554_v21  ;;  %v681_v24 = vrot.slane %v635_v42, %v554_v21 }
 0x190   : > { %582 = vst.msk [vmem:[#allocation2] sm:$0x3] %vm192_vm0, %v580_v22  ;;  %v701_v43 = vsel %vm556_vm11, %v700_v23, %v696_v59  ;;  %v682_v31 = vsel %vm556_vm11, %v681_v24, %v677_v60 }
 0x191   : > { %v702_v36 = vsel %vm577_vm12, %v701_v43, %v682_v31 }
 0x192   : > { %v704_v18 = vmax.f32 %v583_v30, %v702_v36 }
 0x194   : > { %705 = vst.msk [vmem:[#allocation3] sm:$0x3] %vm192_vm0, %v704_v18 }
 0x195 PF:  {}
 0x197   : > { %v709_v32 = vld [vmem:[#allocation2] sm:$0x3] }
 0x198   : > { %711 = vst.msk [vmem:[%s921_s21] sm:$0x3] %vm192_vm0, %v709_v32 }
 0x19b   : > { %v712_v19 = vld [vmem:[#allocation3] sm:$0x3] }
 0x19c   : > { %713 = vst.msk [vmem:[%s926_s24] sm:$0x3] %vm192_vm0, %v712_v19 }
 0x19d PF: > { %s13_s11 = sadd.s32 1, %s868_s11   ;;  %s1365_s9 = smov %s864_s10 }
 0x19e   : > { %p10_p9 = scmp.ge.s32.totalorder %s13_s11, 4   ;;  %s1366_s10 = smov %s1368_s12 }
 0x1a0   :  { %12 = sbr.rel (!%p10_p9) target bundleno = 2 (0x2), region = 82 }

</bundles_post_ra>
